<compile_context>
chip_gen: v5e
topology: v5e:2x2
jax: 0.10.0
libtpu: 0.0.40
codegen_flags: <defaults>
</compile_context>

<pallas_src>
import functools

import jax
import jax.numpy as jnp
from jax.experimental import pallas as pl
from jax.experimental.pallas import tpu as pltpu

LANE = 128      # lane (last-dim) granule
SUBLANE = 8     # sublane (second-to-last dim) granule


def _round_up(n: int, m: int) -> int:
    return ((n + m - 1) // m) * m


def mlp_kernel(x_ref, w1_ref, b1_ref, w2_ref, b2_ref, w3_ref, b3_ref, o_ref):
    """One batch tile: (x @ W1 + b1) -> tanh -> (@ W2 + b2) -> tanh -> (@ W3 + b3).

    x/W refs are bf16 (MXU operands), b refs and the output are f32; each
    jnp.dot accumulates in f32 via preferred_element_type.
    """
    # Layer 1 + tanh (f32 bias add / tanh)
    h1 = jnp.dot(x_ref[...], w1_ref[...], preferred_element_type=jnp.float32)
    h1 = jnp.tanh(h1 + b1_ref[...])

    # Layer 2 + tanh
    h2 = jnp.dot(h1.astype(jnp.bfloat16), w2_ref[...],
                 preferred_element_type=jnp.float32)
    h2 = jnp.tanh(h2 + b2_ref[...])

    # Layer 3 (logits, no activation)
    out = jnp.dot(h2.astype(jnp.bfloat16), w3_ref[...],
                  preferred_element_type=jnp.float32)
    o_ref[...] = (out + b3_ref[...]).astype(o_ref.dtype)


def prepare_params(w1, b1, w2, b2, w3, b3):
    """Pad feature dims to multiples of 128 (zero-fill) and cast weights to bf16.

    Done once at init so the per-call wrapper only pads the activations.
    Weights come in as (fan_in, fan_out); biases as (1, fan_out).
    """
    din, h = w1.shape
    c = w3.shape[1]
    din_p, h_p, c_p = _round_up(din, LANE), _round_up(h, LANE), _round_up(c, LANE)

    def pad2(a, rows, cols):
        return jnp.zeros((rows, cols), a.dtype).at[: a.shape[0], : a.shape[1]].set(a)

    w1p = pad2(w1, din_p, h_p).astype(jnp.bfloat16)
    w2p = pad2(w2, h_p, h_p).astype(jnp.bfloat16)
    w3p = pad2(w3, h_p, c_p).astype(jnp.bfloat16)
    b1p = pad2(b1, 1, h_p).astype(jnp.float32)
    b2p = pad2(b2, 1, h_p).astype(jnp.float32)
    b3p = pad2(b3, 1, c_p).astype(jnp.float32)
    return (w1p, b1p, w2p, b2p, w3p, b3p)


def neural_net_forward(x, padded_params, num_classes):
    """Forward pass. x: (B, input_size) f32/bf16. Returns (B, num_classes) f32."""
    w1, b1, w2, b2, w3, b3 = padded_params
    B, din = x.shape
    din_p, h_p = w1.shape
    c_p = w3.shape[1]

    # Batch tile: sublane-aligned, capped so VMEM footprint stays tiny even on
    # v7x's 64 MiB VMEM (x tile + out tile double-buffered << default limit).
    TM = min(512, _round_up(B, SUBLANE))
    B_p = _round_up(B, TM)
    grid = (B_p // TM,)

    # Zero-pad activations: padded input columns hit zero weight rows, padded
    # batch rows are sliced away, so padding never changes the real outputs.
    x_p = (jnp.zeros((B_p, din_p), jnp.bfloat16)
           .at[:B, :din].set(x.astype(jnp.bfloat16)))

    act_spec = pl.BlockSpec((TM, din_p), lambda i: (i, 0))
    out_spec = pl.BlockSpec((TM, c_p), lambda i: (i, 0))
    # Weights / biases: constant index_map -> fetched once, VMEM-resident.
    resident = lambda shape: pl.BlockSpec(shape, lambda i: (0, 0))

    cost = pl.CostEstimate(
        flops=2 * B_p * (din_p * h_p + h_p * h_p + h_p * c_p),
        transcendentals=2 * B_p * h_p,
        bytes_accessed=(x_p.size * 2 + w1.size * 2 + w2.size * 2 + w3.size * 2
                        + (b1.size + b2.size + b3.size) * 4 + B_p * c_p * 4),
    )

    out_p = pl.pallas_call(
        mlp_kernel,
        out_shape=jax.ShapeDtypeStruct((B_p, c_p), jnp.float32),
        grid_spec=pltpu.PrefetchScalarGridSpec(
            num_scalar_prefetch=0,
            grid=grid,
            in_specs=[
                act_spec,
                resident(w1.shape), resident(b1.shape),
                resident(w2.shape), resident(b2.shape),
                resident(w3.shape), resident(b3.shape),
            ],
            out_specs=out_spec,
        ),
        compiler_params=pltpu.CompilerParams(
            dimension_semantics=("parallel",),
        ),
        cost_estimate=cost,
    )(x_p, w1, b1, w2, b2, w3, b3)

    return out_p[:B, :num_classes]


def init_params(key, input_size, hidden_size, num_classes):
    """Deterministic init mimicking nn.Linear's U(-1/sqrt(fan_in), 1/sqrt(fan_in)).

    Weights are stored (fan_in, fan_out) so the forward is x @ W + b.
    """
    ks = jax.random.split(key, 6)

    def linear(kw, kb, fan_in, fan_out):
        bound = 1.0 / jnp.sqrt(fan_in)
        w = jax.random.uniform(kw, (fan_in, fan_out), jnp.float32, -bound, bound)
        b = jax.random.uniform(kb, (1, fan_out), jnp.float32, -bound, bound)
        return w, b

    w1, b1 = linear(ks[0], ks[1], input_size, hidden_size)
    w2, b2 = linear(ks[2], ks[3], hidden_size, hidden_size)
    w3, b3 = linear(ks[4], ks[5], hidden_size, num_classes)
    return w1, b1, w2, b2, w3, b3


if __name__ == "__main__":
    # TODO(synk): real sizes come from a torch checkpoint (assets/json/data.pth);
    # small synthetic sizes are used here.
    batch = 8
    input_size = 32
    hidden_size = 32
    num_classes = 8

    key = jax.random.PRNGKey(0)
    k_x, k_p = jax.random.split(key)

    x = jax.random.normal(k_x, (batch, input_size), jnp.float32)
    w1, b1, w2, b2, w3, b3 = init_params(k_p, input_size, hidden_size, num_classes)

    padded = prepare_params(w1, b1, w2, b2, w3, b3)
    out = neural_net_forward(x, padded, num_classes)
    out = jax.block_until_ready(out)

    # Pure-JAX reference with the same bf16 operand rounding as the kernel
    # (f32 accumulate), so only summation-order error remains.
    hp = jax.lax.Precision.HIGHEST
    as_bf = lambda a: a.astype(jnp.bfloat16).astype(jnp.float32)
    xb = as_bf(x)
    w1b, w2b, w3b = as_bf(w1), as_bf(w2), as_bf(w3)
    h1 = jnp.tanh(jnp.dot(xb, w1b, precision=hp) + b1)
    h2 = jnp.tanh(jnp.dot(as_bf(h1), w2b, precision=hp) + b2)
    ref = jnp.dot(as_bf(h2), w3b, precision=hp) + b3

    assert out.shape == (batch, num_classes)
    assert jnp.allclose(out, ref, atol=2e-3, rtol=2e-3), (
        float(jnp.max(jnp.abs(out - ref))))

    print("KERNEL_OK")
</pallas_src>

<mosaic_0001>
module attributes {stable_mosaic.version = 11 : i64} {
  func.func @mlp_kernel(%arg0: i32, %arg1: memref<8x128xbf16, #tpu.memory_space<vmem>>, %arg2: memref<128x128xbf16, #tpu.memory_space<vmem>>, %arg3: memref<1x128xf32, #tpu.memory_space<vmem>>, %arg4: memref<128x128xbf16, #tpu.memory_space<vmem>>, %arg5: memref<1x128xf32, #tpu.memory_space<vmem>>, %arg6: memref<128x128xbf16, #tpu.memory_space<vmem>>, %arg7: memref<1x128xf32, #tpu.memory_space<vmem>>, %arg8: memref<8x128xf32, #tpu.memory_space<vmem>>) attributes {dimension_semantics = [#tpu.dimension_semantics<parallel>], iteration_bounds = array<i64: 1>, scalar_prefetch = 0 : i64, scratch_operands = 0 : i64, tpu.core_type = #tpu.core_type<tc>, window_params = [{transform_indices = @transform_0, window_bounds = array<i64: 8, 128>}, {pipeline_mode = #tpu.pipeline_mode<synchronous>, transform_indices = @transform_1, window_bounds = array<i64: 128, 128>}, {pipeline_mode = #tpu.pipeline_mode<synchronous>, transform_indices = @transform_2, window_bounds = array<i64: 1, 128>}, {pipeline_mode = #tpu.pipeline_mode<synchronous>, transform_indices = @transform_3, window_bounds = array<i64: 128, 128>}, {pipeline_mode = #tpu.pipeline_mode<synchronous>, transform_indices = @transform_4, window_bounds = array<i64: 1, 128>}, {pipeline_mode = #tpu.pipeline_mode<synchronous>, transform_indices = @transform_5, window_bounds = array<i64: 128, 128>}, {pipeline_mode = #tpu.pipeline_mode<synchronous>, transform_indices = @transform_6, window_bounds = array<i64: 1, 128>}, {transform_indices = @transform_7, window_bounds = array<i64: 8, 128>}]} {
    %c0 = arith.constant 0 : index
    %c0_0 = arith.constant 0 : index
    %0 = vector.load %arg1[%c0, %c0_0] : memref<8x128xbf16, #tpu.memory_space<vmem>>, vector<8x128xbf16>
    %c0_1 = arith.constant 0 : index
    %c0_2 = arith.constant 0 : index
    %1 = vector.load %arg2[%c0_1, %c0_2] : memref<128x128xbf16, #tpu.memory_space<vmem>>, vector<128x128xbf16>
    %cst = arith.constant dense<0.000000e+00> : vector<8x128xf32>
    %2 = tpu.matmul %0, %1, %cst {dimension_numbers = #tpu.dot_dimension_numbers<[1], [0], [0], [1], [0, 0, 1, 1], [], []>} : vector<8x128xbf16>, vector<128x128xbf16>, vector<8x128xf32> -> vector<8x128xf32>
    %c0_3 = arith.constant 0 : index
    %c0_4 = arith.constant 0 : index
    %3 = vector.load %arg3[%c0_3, %c0_4] : memref<1x128xf32, #tpu.memory_space<vmem>>, vector<1x128xf32>
    %4 = vector.broadcast %3 : vector<1x128xf32> to vector<8x128xf32>
    %5 = arith.addf %2, %4 : vector<8x128xf32>
    %6 = math.tanh %5 : vector<8x128xf32>
    %7 = arith.truncf %6 : vector<8x128xf32> to vector<8x128xbf16>
    %c0_5 = arith.constant 0 : index
    %c0_6 = arith.constant 0 : index
    %8 = vector.load %arg4[%c0_5, %c0_6] : memref<128x128xbf16, #tpu.memory_space<vmem>>, vector<128x128xbf16>
    %cst_7 = arith.constant dense<0.000000e+00> : vector<8x128xf32>
    %9 = tpu.matmul %7, %8, %cst_7 {dimension_numbers = #tpu.dot_dimension_numbers<[1], [0], [0], [1], [0, 0, 1, 1], [], []>} : vector<8x128xbf16>, vector<128x128xbf16>, vector<8x128xf32> -> vector<8x128xf32>
    %c0_8 = arith.constant 0 : index
    %c0_9 = arith.constant 0 : index
    %10 = vector.load %arg5[%c0_8, %c0_9] : memref<1x128xf32, #tpu.memory_space<vmem>>, vector<1x128xf32>
    %11 = vector.broadcast %10 : vector<1x128xf32> to vector<8x128xf32>
    %12 = arith.addf %9, %11 : vector<8x128xf32>
    %13 = math.tanh %12 : vector<8x128xf32>
    %14 = arith.truncf %13 : vector<8x128xf32> to vector<8x128xbf16>
    %c0_10 = arith.constant 0 : index
    %c0_11 = arith.constant 0 : index
    %15 = vector.load %arg6[%c0_10, %c0_11] : memref<128x128xbf16, #tpu.memory_space<vmem>>, vector<128x128xbf16>
    %cst_12 = arith.constant dense<0.000000e+00> : vector<8x128xf32>
    %16 = tpu.matmul %14, %15, %cst_12 {dimension_numbers = #tpu.dot_dimension_numbers<[1], [0], [0], [1], [0, 0, 1, 1], [], []>} : vector<8x128xbf16>, vector<128x128xbf16>, vector<8x128xf32> -> vector<8x128xf32>
    %c0_13 = arith.constant 0 : index
    %c0_14 = arith.constant 0 : index
    %17 = vector.load %arg7[%c0_13, %c0_14] : memref<1x128xf32, #tpu.memory_space<vmem>>, vector<1x128xf32>
    %18 = vector.broadcast %17 : vector<1x128xf32> to vector<8x128xf32>
    %19 = arith.addf %16, %18 : vector<8x128xf32>
    %c0_15 = arith.constant 0 : index
    %c0_16 = arith.constant 0 : index
    %20 = vector.load %arg8[%c0_15, %c0_16] : memref<8x128xf32, #tpu.memory_space<vmem>>, vector<8x128xf32>
    tpu.vector_store %arg8[%c0_15, %c0_16], %19 {strides = array<i32>} : memref<8x128xf32, #tpu.memory_space<vmem>>, vector<8x128xf32>,
    return
  }
  func.func @transform_0(%arg0: i32) -> (i32, i32) {
    %c0_i32 = arith.constant 0 : i32
    %c0_i32_0 = arith.constant 0 : i32
    return %arg0, %c0_i32 : i32, i32
  }
  func.func @transform_1(%arg0: i32) -> (i32, i32) {
    %c0_i32 = arith.constant 0 : i32
    %c0_i32_0 = arith.constant 0 : i32
    %c0_i32_1 = arith.constant 0 : i32
    return %c0_i32, %c0_i32_0 : i32, i32
  }
  func.func @transform_2(%arg0: i32) -> (i32, i32) {
    %c0_i32 = arith.constant 0 : i32
    %c0_i32_0 = arith.constant 0 : i32
    %c0_i32_1 = arith.constant 0 : i32
    return %c0_i32, %c0_i32_0 : i32, i32
  }
  func.func @transform_3(%arg0: i32) -> (i32, i32) {
    %c0_i32 = arith.constant 0 : i32
    %c0_i32_0 = arith.constant 0 : i32
    %c0_i32_1 = arith.constant 0 : i32
    return %c0_i32, %c0_i32_0 : i32, i32
  }
  func.func @transform_4(%arg0: i32) -> (i32, i32) {
    %c0_i32 = arith.constant 0 : i32
    %c0_i32_0 = arith.constant 0 : i32
    %c0_i32_1 = arith.constant 0 : i32
    return %c0_i32, %c0_i32_0 : i32, i32
  }
  func.func @transform_5(%arg0: i32) -> (i32, i32) {
    %c0_i32 = arith.constant 0 : i32
    %c0_i32_0 = arith.constant 0 : i32
    %c0_i32_1 = arith.constant 0 : i32
    return %c0_i32, %c0_i32_0 : i32, i32
  }
  func.func @transform_6(%arg0: i32) -> (i32, i32) {
    %c0_i32 = arith.constant 0 : i32
    %c0_i32_0 = arith.constant 0 : i32
    %c0_i32_1 = arith.constant 0 : i32
    return %c0_i32, %c0_i32_0 : i32, i32
  }
  func.func @transform_7(%arg0: i32) -> (i32, i32) {
    %c0_i32 = arith.constant 0 : i32
    %c0_i32_0 = arith.constant 0 : i32
    return %arg0, %c0_i32 : i32, i32
  }
}

</mosaic_0001>

<bundles_post_ra>
// kernel: tpu_custom_call.1
= control target key start
LH: loop header
LB: loop body
LE: loop exit
PB: predicated region body
PF: predicated region fallthrough
CT: control target
= control target key end

     0   :  { %12 = vsyncpa [#allocation3], 0  ;;  %s689_s0 = inlined_call_operand.hbm [shape: bf16[8,128], index: 0, kind: input, shape index: {}]   ;;  %s690_s1 = inlined_call_operand.hbm [shape: bf16[128,128], index: 1, kind: input, shape index: {}]   ;;  %s691_s2 = inlined_call_operand.vmem [shape: f32[1,128], index: 2, kind: input, shape index: {}]   ;;  %s692_s3 = inlined_call_operand.hbm [shape: bf16[128,128], index: 3, kind: input, shape index: {}]   ;;  %s693_s4 = inlined_call_operand.vmem [shape: f32[1,128], index: 4, kind: input, shape index: {}]   ;;  %s694_s5 = inlined_call_operand.hbm [shape: bf16[128,128], index: 5, kind: input, shape index: {}]   ;;  %s695_s6 = inlined_call_operand.vmem [shape: f32[1,128], index: 6, kind: input, shape index: {}]   ;;  %s696_s7 = inlined_call_operand.hbm [shape: f32[8,128], index: 7, kind: output, shape index: {}]  }
   0x1   :  { %13 = vsyncpa [#allocation6], 0 }
   0x2   :  { %14 = vsyncpa [#allocation9], 0  ;;  %s31_s26 = sshll.u32 %s690_s1, 4  ;;  %s32_s26 = int_to_ptr.hbm [resolvable:$true] %s31_s26 }
   0x3   :  { %15 = vsyncpa [#allocation4], 0  ;;  %s618_s27 = smov [#allocation5]   ;;  %s21_s8 = sshll.u32 %s689_s0, 4  ;;  %s22_s8 = int_to_ptr.hbm [resolvable:$true] %s21_s8 }
   0x4   :  { %s33_s28 = sshll.u32 %s618_s27, 4  ;;  %s619_s9 = smov 64   ;;  %s34_s28 = int_to_ptr.vmem [resolvable:$true] %s33_s28 }
   0x5   :  { %s620_s10 = smov 4   ;;  %s621_s11 = smov [#allocation2]  }
   0x6   :  { %39 = dma.hbm_to_vmem [thread:$0]  %s32_s26, 1024, %s34_s28, [#allocation6], %s619_s9, %s619_s9, %s620_s10  }
   0x7   :  { %s23_s12 = sshll.u32 %s621_s11, 4  ;;  %s46_s15 = sshll.u32 %s692_s3, 4  ;;  %s24_s12 = int_to_ptr.vmem [resolvable:$true] %s23_s12  ;;  %s47_s15 = int_to_ptr.hbm [resolvable:$true] %s46_s15 }
   0x8   :  { %26 = dma.hbm_to_vmem [thread:$0]  %s22_s8, 64, %s24_s12, [#allocation3]  }
   0x9   :  { %s61_s17 = sshll.u32 %s694_s5, 4  ;;  %s622_s18 = smov [#allocation7]   ;;  %s62_s17 = int_to_ptr.hbm [resolvable:$true] %s61_s17 }
   0xa   :  { %s48_s19 = sshll.u32 %s622_s18, 4  ;;  %s623_s0 = smov [#allocation8]   ;;  %s49_s19 = int_to_ptr.vmem [resolvable:$true] %s48_s19 }
   0xb   :  { %54 = dma.hbm_to_vmem [thread:$0]  %s47_s15, 1024, %s49_s19, [#allocation6], %s619_s9, %s619_s9, %s620_s10  }
   0xc   :  { %s63_s20 = sshll.u32 %s623_s0, 4  ;;  %s64_s20 = int_to_ptr.vmem [resolvable:$true] %s63_s20 }
   0xd   :  { %69 = dma.hbm_to_vmem [thread:$0]  %s62_s17, 1024, %s64_s20, [#allocation9], %s619_s9, %s619_s9, %s620_s10  }
   0xe   :  { %610 = dma.done.wait [#allocation3], 64  }
   0xf   :  { %611 = vsyncadd [#allocation3], 4294967232 }
  0x10   :  { %612 = dma.done.wait [#allocation6], 2048  }
  0x11   :  { %613 = vsyncadd [#allocation6], 4294965248 }
  0x12   :  { %614 = dma.done.wait [#allocation9], 1024  }
  0x13   :  { %615 = vsyncadd [#allocation9], 4294966272  ;;  %v459_v0 = vld [vmem:[#allocation5 + $0x38] sm:$0xff]  ;;  %v458_v1 = vld [vmem:[#allocation5 + $0x30] sm:$0xff]  ;;  %s624_s24 = smov [#allocation10]   ;;  %s344_s28 = sshll.u32 %s696_s7, 4  ;;  %s345_s28 = int_to_ptr.hbm [resolvable:$true] %s344_s28 }
  0x14   :  { %157 = vmatpush.bf16.msra.mxu0 %v459_v0  ;;  %v467_v2 = vld [vmem:[#allocation7 + $0x38] sm:$0xff]  ;;  %v466_v3 = vld [vmem:[#allocation7 + $0x30] sm:$0xff]  ;;  %v457_v4 = vld [vmem:[#allocation5 + $0x28] sm:$0xff]  ;;  %s342_s25 = sshll.u32 %s624_s24, 4  ;;  %s343_s25 = int_to_ptr.vmem [resolvable:$true] %s342_s25 }
  0x15   :  { %240 = vmatpush.bf16.msra.mxu1 %v467_v2  ;;  %v465_v5 = vld [vmem:[#allocation7 + $0x28] sm:$0xff]  ;;  %v456_v6 = vld [vmem:[#allocation5 + $0x20] sm:$0xff]  ;;  %v455_v8 = vld [vmem:[#allocation5 + $0x18] sm:$0xff] }
  0x16   :  { %v464_v7 = vld [vmem:[#allocation7 + $0x20] sm:$0xff]  ;;  %v463_v9 = vld [vmem:[#allocation7 + $0x18] sm:$0xff]  ;;  %v454_v10 = vld [vmem:[#allocation5 + $0x10] sm:$0xff] }
  0x17   :  { %v453_v11 = vld [vmem:[#allocation5 + $0x8] sm:$0xff]  ;;  %v452_v12 = vld [vmem:[#allocation5] sm:$0xff]  ;;  %v88_v13 = vld [vmem:[#allocation2] sm:$0xf] }
  0x18   :  { %158 = vmatpush.bf16.msra.mxu0 %v458_v1  ;;  %v462_v14 = vld [vmem:[#allocation7 + $0x10] sm:$0xff]  ;;  %v461_v15 = vld [vmem:[#allocation7 + $0x8] sm:$0xff]  ;;  %v460_v16 = vld [vmem:[#allocation7] sm:$0xff] }
  0x19   :  { %241 = vmatpush.bf16.msra.mxu1 %v466_v3  ;;  %v475_v17 = vld [vmem:[#allocation8 + $0x38] sm:$0xff]  ;;  %v474_v18 = vld [vmem:[#allocation8 + $0x30] sm:$0xff]  ;;  %v473_v19 = vld [vmem:[#allocation8 + $0x28] sm:$0xff] }
  0x1a   :  { %323 = vmatpush.bf16.msra.mxu2 %v475_v17  ;;  %v472_v20 = vld [vmem:[#allocation8 + $0x20] sm:$0xff]  ;;  %v471_v21 = vld [vmem:[#allocation8 + $0x18] sm:$0xff]  ;;  %v470_v28 = vld [vmem:[#allocation8 + $0x10] sm:$0xff] }
  0x1b   :  { %v483_v22 = vld [vmem:[%s691_s2] ss:$0 sm:$0xff]  ;;  %v469_v29 = vld [vmem:[#allocation8 + $0x8] sm:$0xff]  ;;  %v468_v30 = vld [vmem:[#allocation8] sm:$0xff] }
  0x1c   :  { %159 = vmatpush.bf16.msra.mxu0 %v457_v4  ;;  %v484_v31 = vld [vmem:[%s693_s4] ss:$0 sm:$0xff] }
  0x1d   :  { %242 = vmatpush.bf16.msra.mxu1 %v465_v5  ;;  %v485_v37 = vld [vmem:[%s695_s6] ss:$0 sm:$0xff] }
  0x1e   :  { %324 = vmatpush.bf16.msra.mxu2 %v474_v18 }
  0x20   :  { %160 = vmatpush.bf16.msra.mxu0 %v456_v6 }
  0x21   :  { %243 = vmatpush.bf16.msra.mxu1 %v464_v7 }
  0x22   :  { %325 = vmatpush.bf16.msra.mxu2 %v473_v19 }
  0x24   :  { %161 = vmatpush.bf16.msra.mxu0 %v455_v8 }
  0x25   :  { %244 = vmatpush.bf16.msra.mxu1 %v463_v9 }
  0x26   :  { %326 = vmatpush.bf16.msra.mxu2 %v472_v20 }
  0x28   :  { %162 = vmatpush.bf16.msra.mxu0 %v454_v10 }
  0x29   :  { %245 = vmatpush.bf16.msra.mxu1 %v462_v14 }
  0x2a   :  { %327 = vmatpush.bf16.msra.mxu2 %v471_v21 }
  0x2c   :  { %163 = vmatpush.bf16.msra.mxu0 %v453_v11 }
  0x2d   :  { %246 = vmatpush.bf16.msra.mxu1 %v461_v15 }
  0x2e   :  { %328 = vmatpush.bf16.msra.mxu2 %v470_v28 }
  0x30   :  { %164 = vmatpush.bf16.msra.mxu0 %v452_v12 }
  0x31   :  { %247 = vmatpush.bf16.msra.mxu1 %v460_v16 }
  0x32   :  { %329 = vmatpush.bf16.msra.mxu2 %v469_v29 }
  0x33   :  { %165 = vmatmul.bf16.vlgmr.msra.gmra.mxu0 %v88_v13 }
  0x36   :  { %330 = vmatpush.bf16.msra.mxu2 %v468_v30 }
  0xb0   :  { %v166_v23 = vpop.f32.mrf.mxu0 }
  0xb1   :  { %v167_v24 = vadd.f32 %v483_v22, %v166_v23 }
  0xb3   :  { %486 = vtanh.f32 %v167_v24 }
  0xb8   :  { %v168_v25 = vpop.f32.mrf.mxu0 }
  0xb9   :  { %v487_v26 = vpop.eup %486 }
  0xba   :  { %v171_v27 = vpack.c.bf16 %v487_v26, %v487_v26 }
  0xbc   :  { %248 = vmatmul.bf16.vlgmr.msra.gmra.mxu1 %v171_v27 }
 0x139   :  { %v249_v32 = vpop.f32.mrf.mxu1 }
 0x13a   :  { %v250_v33 = vadd.f32 %v484_v31, %v249_v32 }
 0x13c   :  { %488 = vtanh.f32 %v250_v33 }
 0x141   :  { %v251_v34 = vpop.f32.mrf.mxu1 }
 0x142   :  { %v489_v35 = vpop.eup %488 }
 0x143   :  { %v254_v36 = vpack.c.bf16 %v489_v35, %v489_v35 }
 0x145   :  { %331 = vmatmul.bf16.vlgmr.msra.gmra.mxu2 %v254_v36 }
 0x1c8   :  { %v332_v38 = vpop.f32.mrf.mxu2 }
 0x1c9   :  { %v333_v39 = vadd.f32 %v485_v37, %v332_v38 }
 0x1cb   :  { %336 = vst [vmem:[#allocation10] sm:$0xff] %v333_v39 }
 0x1cc   :  { %347 = dma.vmem_to_hbm [thread:$0]  %s343_s25, 128, %s345_s28, [#allocation4]  }
 0x1d0   :  { %v334_v40 = vpop.f32.mrf.mxu2 }
 0x1d1   :  { %616 = dma.done.wait [#allocation4], 128  }
 0x1d2   :  { %617 = vsyncadd [#allocation4], 4294967168 }
 0x1d3   :  { %352 = vsyncpa [#allocation3], 1 }
 0x1d4   :  { %353 = vsyncpa [#allocation6], 1 }
 0x1d5   :  { %354 = vsyncpa [#allocation9], 1 }
 0x1d6   :  { %355 = vsyncpa [#allocation4], 1 }

</bundles_post_ra>
